<compile_context>
chip_gen: v6e
topology: v6e:2x2x1
jax: 0.10.0
libtpu: 0.0.40
codegen_flags: <defaults>
</compile_context>

<pallas_src>
import functools

import jax
import jax.numpy as jnp
from jax.experimental import pallas as pl
from jax.experimental.pallas import tpu as pltpu

IGNORE_INDEX = -1


def _ce_sum_kernel(p1_ref, p2_ref, p3_ref, tgt_ref, out_ref, *, ignore_index, num_cols):
    # p*_ref: (1, C, bm) input dtype ; tgt_ref: (1, 1, bm) int32 ; out_ref: (1, 1, bm) f32
    j = pl.program_id(1)

    @pl.when(j == 0)
    def _():
        out_ref[...] = jnp.zeros_like(out_ref)

    tgt = tgt_ref[...]                                                   # (1, 1, bm)
    bm = tgt.shape[-1]
    col = jax.lax.broadcasted_iota(jnp.int32, (1, 1, bm), 2) + j * bm
    valid = jnp.logical_and(col < num_cols, tgt != ignore_index)         # (1, 1, bm)

    def ce(p_ref):
        x = p_ref[...].astype(jnp.float32)                               # (1, C, bm)
        c = x.shape[1]
        # numerically stable logsumexp over the class (sublane) axis
        row_max = jnp.max(x, axis=1, keepdims=True)                      # (1, 1, bm)
        lse = row_max + jnp.log(
            jnp.sum(jnp.exp(x - row_max), axis=1, keepdims=True))
        # gather the target-class logit via a sublane iota/compare mask
        cls = jax.lax.broadcasted_iota(jnp.int32, (1, c, bm), 1)
        tgt_logit = jnp.sum(jnp.where(cls == tgt, x, 0.0),
                            axis=1, keepdims=True)                       # (1, 1, bm)
        return lse - tgt_logit                                           # per-pixel CE

    total = ce(p1_ref) + ce(p2_ref) + ce(p3_ref)
    out_ref[...] += jnp.where(valid, total, 0.0)


def _choose_block_m(hw, c, itemsize, vmem_budget_bytes=12 << 20, max_bm=4096):
    # 3 preds x 2 pipeline buffers of (1, C, block_m) must fit the budget.
    cap = vmem_budget_bytes // max(1, 6 * c * itemsize)
    cap = max(128, min(max_bm, (cap // 128) * 128))
    if hw % 128 == 0:
        return min(cap, hw)
    # hw not lane aligned: a block equal to the full dim is always legal.
    return hw if hw <= cap else cap


def segmentation_multi_losses(pred1, pred2, pred3, target, *,
                              ignore_index=IGNORE_INDEX, block_m=None):
    """pred{1,2,3}: (N, C, H, W); target: (N, H, W) int.  Returns loss1+loss2+loss3."""
    N, C, H, W = pred1.shape
    HW = H * W
    if block_m is None:
        block_m = _choose_block_m(HW, C, jnp.dtype(pred1.dtype).itemsize)

    # Metadata-only reshapes: NCHW is already (N, C, H*W)-contiguous, so the
    # pixel axis lands on lanes with no HBM transpose / stack / pad / upcast.
    p1 = pred1.reshape(N, C, HW)
    p2 = pred2.reshape(N, C, HW)
    p3 = pred3.reshape(N, C, HW)
    tgt = target.reshape(N, 1, HW).astype(jnp.int32)

    nb = pl.cdiv(HW, block_m)
    kernel = functools.partial(_ce_sum_kernel,
                               ignore_index=ignore_index, num_cols=HW)

    pred_spec = pl.BlockSpec((1, C, block_m), lambda n, j: (n, 0, j))
    partial_sums = pl.pallas_call(
        kernel,
        out_shape=jax.ShapeDtypeStruct((N, 1, block_m), jnp.float32),
        grid=(N, nb),
        in_specs=[
            pred_spec, pred_spec, pred_spec,
            pl.BlockSpec((1, 1, block_m), lambda n, j: (n, 0, j)),
        ],
        out_specs=pl.BlockSpec((1, 1, block_m), lambda n, j: (n, 0, 0)),
        compiler_params=pltpu.CompilerParams(
            dimension_semantics=("parallel", "arbitrary"),
            vmem_limit_bytes=32 * 1024 * 1024,
        ),
    )(p1, p2, p3, tgt)

    total = jnp.sum(partial_sums, dtype=jnp.float32)
    # Denominator shared by the three losses (identical target); computed in the
    # wrapper as a trivial fused XLA reduction instead of an in-kernel counter.
    valid_cnt = jnp.sum((target != ignore_index).astype(jnp.float32))
    # NOTE: if every pixel is ignore_index this yields NaN, matching PyTorch.
    return (total / valid_cnt).astype(jnp.float32)


def _reference(pred1, pred2, pred3, target, ignore_index=IGNORE_INDEX):
    def ce(pred):
        p = jnp.transpose(pred, (0, 2, 3, 1)).astype(jnp.float32)   # NHWC
        logp = jax.nn.log_softmax(p, axis=-1)
        t = target.astype(jnp.int32)
        valid = t != ignore_index
        t_safe = jnp.where(valid, t, 0)
        nll = -jnp.take_along_axis(logp, t_safe[..., None], axis=-1)[..., 0]
        nll = jnp.where(valid, nll, 0.0)
        return jnp.sum(nll) / jnp.sum(valid.astype(jnp.float32))
    return ce(pred1) + ce(pred2) + ce(pred3)


if __name__ == "__main__":
    # TODO(synk): per-class `weight` (default None in the module) is not implemented.
    key = jax.random.PRNGKey(0)
    k1, k2, k3, k4 = jax.random.split(key, 4)
    N, C, H, W = 2, 4, 16, 16

    pred1 = jax.random.normal(k1, (N, C, H, W), dtype=jnp.float32)
    pred2 = jax.random.normal(k2, (N, C, H, W), dtype=jnp.float32)
    pred3 = jax.random.normal(k3, (N, C, H, W), dtype=jnp.float32)
    # targets in [-1, C): -1 pixels are ignored (ignore_index=-1)
    target = jax.random.randint(k4, (N, H, W), -1, C, dtype=jnp.int32)

    loss = jax.block_until_ready(segmentation_multi_losses(pred1, pred2, pred3, target))
    ref = jax.block_until_ready(_reference(pred1, pred2, pred3, target))
    assert abs(float(loss) - float(ref)) < 2e-4, (float(loss), float(ref))

    print("KERNEL_OK")
</pallas_src>

<mosaic_0001>
module attributes {stable_mosaic.version = 11 : i64} {
  func.func @_ce_sum_kernel(%arg0: i32, %arg1: i32, %arg2: memref<1x4x256xf32, #tpu.memory_space<vmem>>, %arg3: memref<1x4x256xf32, #tpu.memory_space<vmem>>, %arg4: memref<1x4x256xf32, #tpu.memory_space<vmem>>, %arg5: memref<1x1x256xi32, #tpu.memory_space<vmem>>, %arg6: memref<1x1x256xf32, #tpu.memory_space<vmem>>) attributes {dimension_semantics = [#tpu.dimension_semantics<parallel>, #tpu.dimension_semantics<arbitrary>], iteration_bounds = array<i64: 2, 1>, scalar_prefetch = 0 : i64, scratch_operands = 0 : i64, tpu.core_type = #tpu.core_type<tc>, window_params = [{transform_indices = @transform_0, window_bounds = array<i64: 1, 4, 256>}, {transform_indices = @transform_1, window_bounds = array<i64: 1, 4, 256>}, {transform_indices = @transform_2, window_bounds = array<i64: 1, 4, 256>}, {transform_indices = @transform_3, window_bounds = array<i64: 1, 1, 256>}, {transform_indices = @transform_4, window_bounds = array<i64: 1, 1, 256>}]} {
    %c0_i32 = arith.constant 0 : i32
    %0 = arith.cmpi eq, %arg1, %c0_i32 : i32
    %1 = arith.extui %0 : i1 to i32
    %c0_i32_0 = arith.constant 0 : i32
    %2 = arith.cmpi ne, %1, %c0_i32_0 : i32
    scf.if %2 {
      %cst_31 = arith.constant 0.000000e+00 : f32
      %74 = vector.broadcast %cst_31 : f32 to vector<1x1x256xf32>
      %c0_32 = arith.constant 0 : index
      %c0_33 = arith.constant 0 : index
      %c0_34 = arith.constant 0 : index
      %75 = vector.load %arg6[%c0_32, %c0_33, %c0_34] : memref<1x1x256xf32, #tpu.memory_space<vmem>>, vector<1x1x256xf32>
      tpu.vector_store %arg6[%c0_32, %c0_33, %c0_34], %74 {strides = array<i32>} : memref<1x1x256xf32, #tpu.memory_space<vmem>>, vector<1x1x256xf32>,
    } else {
    }
    %c0 = arith.constant 0 : index
    %c0_1 = arith.constant 0 : index
    %c0_2 = arith.constant 0 : index
    %3 = vector.load %arg5[%c0, %c0_1, %c0_2] : memref<1x1x256xi32, #tpu.memory_space<vmem>>, vector<1x1x256xi32>
    %4 = tpu.iota {dimensions = array<i32: 2>} : vector<1x1x256xi32>
    %c256_i32 = arith.constant 256 : i32
    %5 = arith.muli %arg1, %c256_i32 : i32
    %6 = vector.broadcast %5 : i32 to vector<1x1x256xi32>
    %7 = arith.addi %4, %6 : vector<1x1x256xi32>
    %c256_i32_3 = arith.constant 256 : i32
    %8 = vector.broadcast %c256_i32_3 : i32 to vector<1x1x256xi32>
    %9 = arith.cmpi slt, %7, %8 : vector<1x1x256xi32>
    %c-1_i32 = arith.constant -1 : i32
    %10 = vector.broadcast %c-1_i32 : i32 to vector<1x1x256xi32>
    %11 = arith.cmpi ne, %3, %10 : vector<1x1x256xi32>
    %12 = arith.andi %9, %11 : vector<1x1x256xi1>
    %c0_4 = arith.constant 0 : index
    %c0_5 = arith.constant 0 : index
    %c0_6 = arith.constant 0 : index
    %13 = vector.load %arg2[%c0_4, %c0_5, %c0_6] : memref<1x4x256xf32, #tpu.memory_space<vmem>>, vector<1x4x256xf32>
    %cst = arith.constant dense<0xFF800000> : vector<1x256xf32>
    %14 = vector.multi_reduction <maximumf>, %13, %cst [1] : vector<1x4x256xf32> to vector<1x256xf32>
    %15 = vector.shape_cast %14 : vector<1x256xf32> to vector<1x1x256xf32>
    %16 = vector.broadcast %15 : vector<1x1x256xf32> to vector<1x4x256xf32>
    %17 = arith.subf %13, %16 : vector<1x4x256xf32>
    %18 = math.exp %17 : vector<1x4x256xf32>
    %cst_7 = arith.constant dense<0.000000e+00> : vector<1x256xf32>
    %19 = vector.multi_reduction <add>, %18, %cst_7 [1] : vector<1x4x256xf32> to vector<1x256xf32>
    %20 = vector.shape_cast %19 : vector<1x256xf32> to vector<1x1x256xf32>
    %21 = math.log %20 : vector<1x1x256xf32>
    %22 = arith.addf %15, %21 : vector<1x1x256xf32>
    %23 = tpu.iota {dimensions = array<i32: 1>} : vector<1x4x256xi32>
    %24 = vector.broadcast %3 : vector<1x1x256xi32> to vector<1x4x256xi32>
    %25 = arith.cmpi eq, %23, %24 : vector<1x4x256xi32>
    %cst_8 = arith.constant 0.000000e+00 : f32
    %26 = vector.broadcast %cst_8 : f32 to vector<1x4x256xf32>
    %27 = arith.select %25, %13, %26 : vector<1x4x256xi1>, vector<1x4x256xf32>
    %cst_9 = arith.constant dense<0.000000e+00> : vector<1x256xf32>
    %28 = vector.multi_reduction <add>, %27, %cst_9 [1] : vector<1x4x256xf32> to vector<1x256xf32>
    %29 = vector.shape_cast %28 : vector<1x256xf32> to vector<1x1x256xf32>
    %30 = arith.subf %22, %29 : vector<1x1x256xf32>
    %c0_10 = arith.constant 0 : index
    %c0_11 = arith.constant 0 : index
    %c0_12 = arith.constant 0 : index
    %31 = vector.load %arg3[%c0_10, %c0_11, %c0_12] : memref<1x4x256xf32, #tpu.memory_space<vmem>>, vector<1x4x256xf32>
    %cst_13 = arith.constant dense<0xFF800000> : vector<1x256xf32>
    %32 = vector.multi_reduction <maximumf>, %31, %cst_13 [1] : vector<1x4x256xf32> to vector<1x256xf32>
    %33 = vector.shape_cast %32 : vector<1x256xf32> to vector<1x1x256xf32>
    %34 = vector.broadcast %33 : vector<1x1x256xf32> to vector<1x4x256xf32>
    %35 = arith.subf %31, %34 : vector<1x4x256xf32>
    %36 = math.exp %35 : vector<1x4x256xf32>
    %cst_14 = arith.constant dense<0.000000e+00> : vector<1x256xf32>
    %37 = vector.multi_reduction <add>, %36, %cst_14 [1] : vector<1x4x256xf32> to vector<1x256xf32>
    %38 = vector.shape_cast %37 : vector<1x256xf32> to vector<1x1x256xf32>
    %39 = math.log %38 : vector<1x1x256xf32>
    %40 = arith.addf %33, %39 : vector<1x1x256xf32>
    %41 = tpu.iota {dimensions = array<i32: 1>} : vector<1x4x256xi32>
    %42 = vector.broadcast %3 : vector<1x1x256xi32> to vector<1x4x256xi32>
    %43 = arith.cmpi eq, %41, %42 : vector<1x4x256xi32>
    %cst_15 = arith.constant 0.000000e+00 : f32
    %44 = vector.broadcast %cst_15 : f32 to vector<1x4x256xf32>
    %45 = arith.select %43, %31, %44 : vector<1x4x256xi1>, vector<1x4x256xf32>
    %cst_16 = arith.constant dense<0.000000e+00> : vector<1x256xf32>
    %46 = vector.multi_reduction <add>, %45, %cst_16 [1] : vector<1x4x256xf32> to vector<1x256xf32>
    %47 = vector.shape_cast %46 : vector<1x256xf32> to vector<1x1x256xf32>
    %48 = arith.subf %40, %47 : vector<1x1x256xf32>
    %49 = arith.addf %30, %48 : vector<1x1x256xf32>
    %c0_17 = arith.constant 0 : index
    %c0_18 = arith.constant 0 : index
    %c0_19 = arith.constant 0 : index
    %50 = vector.load %arg4[%c0_17, %c0_18, %c0_19] : memref<1x4x256xf32, #tpu.memory_space<vmem>>, vector<1x4x256xf32>
    %cst_20 = arith.constant dense<0xFF800000> : vector<1x256xf32>
    %51 = vector.multi_reduction <maximumf>, %50, %cst_20 [1] : vector<1x4x256xf32> to vector<1x256xf32>
    %52 = vector.shape_cast %51 : vector<1x256xf32> to vector<1x1x256xf32>
    %53 = vector.broadcast %52 : vector<1x1x256xf32> to vector<1x4x256xf32>
    %54 = arith.subf %50, %53 : vector<1x4x256xf32>
    %55 = math.exp %54 : vector<1x4x256xf32>
    %cst_21 = arith.constant dense<0.000000e+00> : vector<1x256xf32>
    %56 = vector.multi_reduction <add>, %55, %cst_21 [1] : vector<1x4x256xf32> to vector<1x256xf32>
    %57 = vector.shape_cast %56 : vector<1x256xf32> to vector<1x1x256xf32>
    %58 = math.log %57 : vector<1x1x256xf32>
    %59 = arith.addf %52, %58 : vector<1x1x256xf32>
    %60 = tpu.iota {dimensions = array<i32: 1>} : vector<1x4x256xi32>
    %61 = vector.broadcast %3 : vector<1x1x256xi32> to vector<1x4x256xi32>
    %62 = arith.cmpi eq, %60, %61 : vector<1x4x256xi32>
    %cst_22 = arith.constant 0.000000e+00 : f32
    %63 = vector.broadcast %cst_22 : f32 to vector<1x4x256xf32>
    %64 = arith.select %62, %50, %63 : vector<1x4x256xi1>, vector<1x4x256xf32>
    %cst_23 = arith.constant dense<0.000000e+00> : vector<1x256xf32>
    %65 = vector.multi_reduction <add>, %64, %cst_23 [1] : vector<1x4x256xf32> to vector<1x256xf32>
    %66 = vector.shape_cast %65 : vector<1x256xf32> to vector<1x1x256xf32>
    %67 = arith.subf %59, %66 : vector<1x1x256xf32>
    %68 = arith.addf %49, %67 : vector<1x1x256xf32>
    %c0_24 = arith.constant 0 : index
    %c0_25 = arith.constant 0 : index
    %c0_26 = arith.constant 0 : index
    %69 = vector.load %arg6[%c0_24, %c0_25, %c0_26] : memref<1x1x256xf32, #tpu.memory_space<vmem>>, vector<1x1x256xf32>
    %cst_27 = arith.constant 0.000000e+00 : f32
    %70 = vector.broadcast %cst_27 : f32 to vector<1x1x256xf32>
    %71 = arith.select %12, %68, %70 : vector<1x1x256xi1>, vector<1x1x256xf32>
    %72 = arith.addf %69, %71 : vector<1x1x256xf32>
    %c0_28 = arith.constant 0 : index
    %c0_29 = arith.constant 0 : index
    %c0_30 = arith.constant 0 : index
    %73 = vector.load %arg6[%c0_28, %c0_29, %c0_30] : memref<1x1x256xf32, #tpu.memory_space<vmem>>, vector<1x1x256xf32>
    tpu.vector_store %arg6[%c0_28, %c0_29, %c0_30], %72 {strides = array<i32>} : memref<1x1x256xf32, #tpu.memory_space<vmem>>, vector<1x1x256xf32>,
    return
  }
  func.func @transform_0(%arg0: i32, %arg1: i32) -> (i32, i32, i32) {
    %c0_i32 = arith.constant 0 : i32
    %c0_i32_0 = arith.constant 0 : i32
    return %arg0, %c0_i32, %arg1 : i32, i32, i32
  }
  func.func @transform_1(%arg0: i32, %arg1: i32) -> (i32, i32, i32) {
    %c0_i32 = arith.constant 0 : i32
    %c0_i32_0 = arith.constant 0 : i32
    return %arg0, %c0_i32, %arg1 : i32, i32, i32
  }
  func.func @transform_2(%arg0: i32, %arg1: i32) -> (i32, i32, i32) {
    %c0_i32 = arith.constant 0 : i32
    %c0_i32_0 = arith.constant 0 : i32
    return %arg0, %c0_i32, %arg1 : i32, i32, i32
  }
  func.func @transform_3(%arg0: i32, %arg1: i32) -> (i32, i32, i32) {
    %c0_i32 = arith.constant 0 : i32
    %c0_i32_0 = arith.constant 0 : i32
    return %arg0, %c0_i32, %arg1 : i32, i32, i32
  }
  func.func @transform_4(%arg0: i32, %arg1: i32) -> (i32, i32, i32) {
    %c0_i32 = arith.constant 0 : i32
    %c0_i32_0 = arith.constant 0 : i32
    %c0_i32_1 = arith.constant 0 : i32
    return %arg0, %c0_i32, %c0_i32_0 : i32, i32, i32
  }
}

</mosaic_0001>

<bundles_post_ra>
// kernel: tpu_custom_call.1
= control target key start
LH: loop header
LB: loop body
LE: loop exit
PB: predicated region body
PF: predicated region fallthrough
CT: control target
= control target key end

     0   :  { %s1434_s0 = inlined_call_operand.hbm [shape: f32[2,4,256], index: 0, kind: input, shape index: {}]   ;;  %s1435_s1 = inlined_call_operand.hbm [shape: f32[2,4,256], index: 1, kind: input, shape index: {}]   ;;  %s1436_s2 = inlined_call_operand.hbm [shape: f32[2,4,256], index: 2, kind: input, shape index: {}]   ;;  %s1437_s3 = inlined_call_operand.vmem [shape: s32[2,1,256], index: 3, kind: input, shape index: {}]   ;;  %s1438_s4 = inlined_call_operand.hbm [shape: f32[2,1,256], index: 4, kind: output, shape index: {}]  }
   0x1   :  { %1442 = sst [smem:[#allocation15_spill]] %s1435_s1 }
   0x2   :  { %9 = vsyncpa [#allocation3], 0 }
   0x3   :  { %11 = vsyncpa [#allocation3 + $0x1], 0 }
   0x4   :  { %12 = vsyncpa [#allocation6], 0 }
   0x5   :  { %14 = vsyncpa [#allocation6 + $0x1], 0 }
   0x6   :  { %15 = vsyncpa [#allocation4], 0 }
   0x7   :  { %17 = vsyncpa [#allocation4 + $0x1], 0  ;;  %s1108_s15 = smov 0   ;;  %s1110_s16 = smov 0  }
   0x8   :  { %s1112_s17 = smov 0   ;;  %s1114_s18 = smov 0  }
   0x9   :  { %s1116_s19 = smov 0   ;;  %s1118_s20 = smov 0  }
   0xa LB: > { %1443 = sst [smem:[#allocation12_spill]] %s1070_s19  ;;  %s1139_s21 = sadd.s32 4294967295, %s1074_s20   ;;  %s1074_s20 = sphi %s1118_s20, %s23_s20   ;;  %s1070_s19 = sphi %s1116_s19, %s1459_s19   ;;  %s1066_s18 = sphi %s1114_s18, %s1458_s18   ;;  %s1062_s17 = sphi %s1112_s17, %s1462_s17   ;;  %s1058_s16 = sphi %s1110_s16, %s1461_s16   ;;  %s1054_s15 = sphi %s1108_s15, %s1460_s15  }
   0xb   : > { %s783_s22 = sadd.s32 4294967294, %s1074_s20   ;;  %s35_s23 = sadd.s32 1, %s1070_s19 }
   0xc   : > { %s44_s24 = sadd.s32 1, %s1062_s17  ;;  %p37_p0 = scmp.ge.s32.totalorder %s35_s23, 2 }
   0xd   : > { %p51_p1 = scmp.ne.s32.totalorder %s1062_s17, %s1058_s16  ;;  %p52_p2 = scmp.eq.s32.totalorder %s1074_s20, 0 }
   0xe   : > { %p57_p3 = scmp.ne.s32.totalorder %s1058_s16, %s1054_s15  ;;  %s1464_s23 = smov (%p37_p0, %s35_s23), 0 }
   0xf   : > { %1444 = sst [smem:[#allocation13_spill]] %s1464_s23  ;;  %p1151_p4 = por %p52_p2, %p51_p1 }
  0x10   : > { %p58_p5 = scmp.eq.s32.totalorder %s1139_s21, 0  ;;  %s39_s26 = ssub.s32 %s1070_s19, %s1464_s23 }
  0x11   : > { %p165_p6 = scmp.eq.s32.totalorder %s1139_s21, 1  ;;  %p42_p7 = scmp.eq.s32.totalorder %s39_s26, 0 }
  0x12   : > { %p1159_p8 = por %p58_p5, %p57_p3  ;;  %p171_p10 = scmp.eq.s32.totalorder %s783_s22, 1 }
  0x13   : > { %p1163_p9 = por %p165_p6, %p51_p1  ;;  %p832_p13 = scmp.lt.s32.totalorder %s1074_s20, 2 }
  0x14   : > { %s1168_s29 = scalar_select %p42_p7, %s1062_s17, %s44_s24  }
  0x15   : > { %p1170_p11 = por %p171_p10, %p57_p3  ;;  %s1439_s5 = sand.u32 1, %s1062_s17  }
  0x16   : > { %1448 = sst [smem:[#allocation14_spill]] %s1168_s29  ;;  %s1179_s6 = sshll.u32 %s1439_s5, 3 }
  0x17   : > { %s1182_s7 = sshll.u32 %s1070_s19, 7  ;;  %p1186_p0 = pnand %p832_p13, %p1151_p4 }
  0x18   : > { %s212_s9 = sand.u32 1, %s1074_s20   ;;  %s1451_s1 = sld [smem:[#allocation15_spill]] }
  0x19   : > { %s216_s13 = scalar_lea.vmem [#allocation5], %s1179_s6  ;;  %p795_p1 = scmp.ge.s32.totalorder %s1074_s20, 1 }
  0x1a   : > { %s226_s14 = sshll.u32 %s216_s13, 4  ;;  %p264_p2 = scmp.lt.s32.totalorder %s1074_s20, 3  ;;  %s227_s14 = int_to_ptr.vmem [resolvable:$true] %s226_s14 }
  0x1b   : > { %s1198_s22 = scalar_lea.sflag [#allocation6], %s212_s9  ;;  %p908_p3 = pneg %p1186_p0 }
  0x1c   : > { %s919_s24 = scalar_lea.vmem %s227_s14, 128  ;;  %s1076_s25 = smov [#allocation5]  }
  0x1d   : > { %p920_p4 = scmp.ne.s32.totalorder %s227_s14, %s919_s24  ;;  %s924_s26 = sshll.u32 %s1076_s25, 4  ;;  %s925_s26 = int_to_ptr.vmem [resolvable:$false] %s924_s26 }
  0x1e   : > { %s224_s12 = scalar_lea.hbm %s1451_s1, %s1182_s7  ;;  %s926_s10 = scalar_lea.vmem %s925_s26, 256 }
  0x1f   : > { %p922_p5 = pnand %p920_p4, %p908_p3  ;;  %p927_p7 = scmp.lt.s32.totalorder %s227_s14, %s925_s26 }
  0x20   : > { %p928_p10 = scmp.lt.s32.totalorder %s926_s10, %s919_s24 }
  0x21   : > { %p923_p6 = pneg %p922_p5 }
  0x22   : > { %p929_p13 = por %p928_p10, %p927_p7 }
  0x24   : > { %p930_p12 = pnand %p929_p13, %p923_p6 }
  0x26   : > { %933 = shalt.err (!%p930_p12)
}
  0x27   : > { %824 = dma.hbm_to_vmem [thread:$0]  (!%p1186_p0), %s224_s12, 128, %s227_s14, %s1198_s22  }
  0x28   : > { %p1212_p4 = pnand %p795_p1, %p264_p2  ;;  %s203_s24 = scalar_lea.hbm %s1434_s0, %s1182_s7 }
  0x29   : > { %s195_s25 = scalar_lea.vmem [#allocation2], %s1179_s6  ;;  %s245_s1 = scalar_lea.hbm %s1436_s2, %s1182_s7 }
  0x2a   : > { %s205_s26 = sshll.u32 %s195_s25, 4  ;;  %s1453_s23 = sand.u32 1, %s1062_s17   ;;  %s206_s26 = int_to_ptr.vmem [resolvable:$true] %s205_s26 }
  0x2b   : > { %s192_s19 = scalar_lea.sflag [#allocation3], %s1453_s23  ;;  %s947_s12 = scalar_lea.vmem %s206_s26, 128 }
  0x2c   : > { %p948_p12 = scmp.ne.s32.totalorder %s206_s26, %s947_s12  ;;  %s1077_s14 = smov [#allocation2]  }
  0x2d   : > { %s952_s29 = sshll.u32 %s1077_s14, 4  ;;  %s953_s29 = int_to_ptr.vmem [resolvable:$false] %s952_s29 }
  0x2e   : > { %p950_p1 = pnand %p948_p12, %p908_p3  ;;  %s954_s11 = scalar_lea.vmem %s953_s29, 256 }
  0x2f   : > { %p955_p5 = scmp.lt.s32.totalorder %s206_s26, %s953_s29  ;;  %p956_p6 = scmp.lt.s32.totalorder %s954_s11, %s947_s12 }
  0x30   : > { %p951_p2 = pneg %p950_p1 }
  0x31   : > { %p957_p7 = por %p956_p6, %p955_p5 }
  0x33   : > { %p958_p10 = pnand %p957_p7, %p951_p2 }
  0x35   : > { %961 = shalt.err (!%p958_p10)
}
  0x36   : > { %821 = dma.hbm_to_vmem [thread:$0]  (!%p1186_p0), %s203_s24, 128, %s206_s26, %s192_s19  }
  0x37   : > { %s237_s23 = scalar_lea.vmem [#allocation7], %s1179_s6  ;;  %s1078_s25 = smov [#allocation7]  }
  0x38   : > { %s247_s5 = sshll.u32 %s237_s23, 4  ;;  %s980_s29 = sshll.u32 %s1078_s25, 4  ;;  %s248_s5 = int_to_ptr.vmem [resolvable:$true] %s247_s5  ;;  %s981_s29 = int_to_ptr.vmem [resolvable:$false] %s980_s29 }
  0x39   : > { %s975_s13 = scalar_lea.vmem %s248_s5, 128  ;;  %s982_s10 = scalar_lea.vmem %s981_s29, 256 }
  0x3a   : > { %p976_p13 = scmp.ne.s32.totalorder %s248_s5, %s975_s13  ;;  %p983_p2 = scmp.lt.s32.totalorder %s248_s5, %s981_s29 }
  0x3b   : > { %p984_p5 = scmp.lt.s32.totalorder %s982_s10, %s975_s13 }
  0x3c   : > { %p978_p12 = pnand %p976_p13, %p908_p3 }
  0x3d   : > { %p985_p6 = por %p984_p5, %p983_p2 }
  0x3e   : > { %p979_p1 = pneg %p978_p12 }
  0x40   : > { %p986_p7 = pnand %p985_p6, %p979_p1 }
  0x42   : > { %989 = shalt.err (!%p986_p7)
}
  0x43   : > { %827 = dma.hbm_to_vmem [thread:$0]  (!%p1186_p0), %s245_s1, 128, %s248_s5, %s1198_s22  }
  0x44   : > { %268 = sbr.rel (%p1212_p4) target bundleno = 176 (0xb0), region = 36  ;;  %s1247_s24 = sand.u32 (!%p1212_p4), 1, %s1058_s16  }
  0x45   : > { %s1250_s26 = sshll.u32 (!%p1212_p4), %s1247_s24, 3  ;;  %s271_s8 = scalar_lea.sflag (!%p1212_p4), [#allocation3], %s1247_s24 }
  0x46   : > { %s274_s12 = scalar_lea.vmem (!%p1212_p4), [#allocation2], %s1250_s26 }
  0x49   : > { %1041 = dma.done.wait (%p1159_p8), %s271_s8, 128  }
  0x4a   : > { %1043 = vsyncadd (%p1159_p8), %s271_s8, 4294967168  ;;  %s279_s1 = sand.u32 1, %s1139_s21   ;;  %s283_s22 = scalar_lea.vmem [#allocation5], %s1250_s26 }
  0x4b   : > { %s280_s7 = scalar_lea.sflag [#allocation6], %s279_s1 }
  0x4c   : > { %1045 = dma.done.wait (%p1159_p8), %s280_s7, 256  }
  0x4d   : > { %1047 = vsyncadd (%p1159_p8), %s280_s7, 4294967040  ;;  %s799_s9 = sshll.u32 %s1247_s24, 1  ;;  %v351_v0 = vlaneseq  ;;  %v1079_v2 = vmov 0.0   ;;  %vm384_vm1 = vcmask 1043456   ;;  %v1275_v3 = vld [vmem:[%s274_s12] sm:$0xff]  ;;  %v1277_v4 = vld [vmem:[%s283_s22] sm:$0xff] }
  0x4e   : > { %s1270_s14 = scalar_lea.vmem [#allocation8], %s799_s9  ;;  %v1281_v5 = vcombine.high %v1275_v3, %v1275_v3  ;;  %v385_v6 = vsel %vm384_vm1, %v1275_v3, -inf  ;;  %v1289_v9 = vcombine.high %v1277_v4, %v1277_v4  ;;  %v463_v14 = vsel %vm384_vm1, %v1277_v4, -inf  ;;  %s292_s21 = scalar_lea.vmem [#allocation7], %s1250_s26 }
  0x4f   : > { %vm1266_vm0 = vcmp.lt.s32.totalorder %v351_v0, 256  ;;  %v386_v7 = vrot.slane %v385_v6, 4  ;;  %v464_v18 = vrot.slane %v463_v14, 4  ;;  %v1296_v24 = vld [vmem:[%s292_s21] sm:$0xff]  ;;  %p339_p8 = scmp.lt.s32.totalorder %s1066_s18, 1  ;;  %v1323_v55 = vshrl.u32 %v351_v0, 7 }
  0x50   : > { %355 = vst.msk [vmem:[%s1270_s14] sm:$0x3] %vm1266_vm0, %v1079_v2  ;;  %v392_v8 = vsel %vm384_vm1, %v1281_v5, -inf  ;;  %v470_v15 = vsel %vm384_vm1, %v1289_v9, -inf  ;;  %v1304_v31 = vcombine.high %v1296_v24, %v1296_v24  ;;  %v531_v35 = vsel %vm384_vm1, %v1296_v24, -inf  ;;  %s809_s25 = sshll.u32 %s1066_s18, 5 }
  0x51   : > { %v387_v10 = vmax.f32 %v385_v6, %v386_v7  ;;  %v393_v11 = vrot.slane %v392_v8, 4  ;;  %v471_v19 = vrot.slane %v470_v15, 4  ;;  %v465_v22 = vmax.f32 %v463_v14, %v464_v18  ;;  %s340_s27 = scalar_select %p339_p8, %s1066_s18, 1 }
  0x52   : > { %v532_v39 = vrot.slane %v531_v35, 4  ;;  %v538_v40 = vsel %vm384_vm1, %v1304_v31, -inf  ;;  %v370_v59 = vsub.s32 0, %v1323_v55  ;;  %v374_v60 = vsub.s32 1, %v1323_v55  ;;  %s637_s29 = sshll.u32 %s1270_s14, 4  ;;  %s635_s6 = scalar_lea.hbm %s1438_s4, %s809_s25  ;;  %s638_s29 = int_to_ptr.vmem [resolvable:$true] %s637_s29 }
  0x53   : > { %v388_v12 = vrot.slane %v387_v10, 2  ;;  %v394_v13 = vmax.f32 %v392_v8, %v393_v11  ;;  %v472_v23 = vmax.f32 %v470_v15, %v471_v19  ;;  %v466_v27 = vrot.slane %v465_v22, 2  ;;  %s800_s11 = sshll.u32 %s340_s27, 1  ;;  %s623_s26 = scalar_lea.sflag [#allocation4], %s1247_s24 }
  0x54   : > { %v539_v42 = vrot.slane %v538_v40, 4  ;;  %v533_v44 = vmax.f32 %v531_v35, %v532_v39  ;;  %s345_s13 = scalar_lea.vmem %s1437_s3, %s800_s11  ;;  %s990_s8 = scalar_lea.vmem %s638_s29, 32 }
  0x55   : > { %v389_v16 = vmax.f32 %v387_v10, %v388_v12  ;;  %v395_v17 = vrot.slane %v394_v13, 2  ;;  %v473_v28 = vrot.slane %v472_v23, 2  ;;  %v467_v30 = vmax.f32 %v465_v22, %v466_v27  ;;  %v1336_v61 = vld [vmem:[%s345_s13] sm:$0x3]  ;;  %p991_p0 = scmp.ne.s32.totalorder %s638_s29, %s990_s8  ;;  %s1082_s12 = smov [#allocation8]  }
  0x56   : > { %v540_v46 = vmax.f32 %v538_v40, %v539_v42  ;;  %v534_v47 = vrot.slane %v533_v44, 2  ;;  %v434_v7 = vrot.slane %v1336_v61, %v370_v59  ;;  %v438_v8 = vrot.slane %v1336_v61, %v374_v60  ;;  %s994_s1 = sshll.u32 %s1082_s12, 4  ;;  %s995_s1 = int_to_ptr.vmem [resolvable:$false] %s994_s1 }
  0x57   : > { %v390_v20 = vrot.slane %v389_v16, 1  ;;  %v396_v21 = vmax.f32 %v394_v13, %v395_v17  ;;  %v474_v32 = vmax.f32 %v472_v23, %v473_v28  ;;  %v468_v34 = vrot.slane %v467_v30, 1  ;;  %p992_p3 = pnand %p991_p0, %p1163_p9  ;;  %s996_s18 = scalar_lea.vmem %s995_s1, 64 }
  0x58   : > { %v541_v49 = vrot.slane %v540_v46, 2  ;;  %v535_v50 = vmax.f32 %v533_v44, %v534_v47  ;;  %vm439_vm2 = vcmp.eq.s32.totalorder %v1323_v55, %v434_v7  ;;  %vm440_vm3 = vcmp.eq.s32.totalorder %v1323_v55, %v438_v8  ;;  %p997_p10 = scmp.lt.s32.totalorder %s638_s29, %s995_s1  ;;  %p998_p13 = scmp.lt.s32.totalorder %s996_s18, %s990_s8 }
  0x59   : > { %v1298_v25 = vmax.f32 %v389_v16, %v390_v20  ;;  %v397_v26 = vrot.slane %v396_v21, 1  ;;  %v475_v36 = vrot.slane %v474_v32, 1  ;;  %v1311_v38 = vmax.f32 %v467_v30, %v468_v34  ;;  %p993_p4 = pneg %p992_p3 }
  0x5a   : > { %v542_v52 = vmax.f32 %v540_v46, %v541_v49  ;;  %v536_v53 = vrot.slane %v535_v50, 1  ;;  %v441_v22 = vsel %vm439_vm2, %v1275_v3, 0.0  ;;  %v508_v39 = vsel %vm440_vm3, %v1289_v9, 0.0  ;;  %p999_p12 = por %p998_p13, %p997_p10 }
  0x5b   : > { %v1300_v29 = vmax.f32 %v396_v21, %v397_v26  ;;  %v1316_v41 = vmax.f32 %v474_v32, %v475_v36  ;;  %v442_v26 = vsel %vm440_vm3, %v1281_v5, 0.0  ;;  %v443_v34 = vsel %vm384_vm1, %v441_v22, 0.0 }
  0x5c   : > { %v543_v54 = vrot.slane %v542_v52, 1  ;;  %v1325_v56 = vmax.f32 %v535_v50, %v536_v53  ;;  %v516_v49 = vsel %vm384_vm1, %v508_v39, 0.0  ;;  %v575_v9 = vsel %vm439_vm2, %v1296_v24, 0.0  ;;  %p1000_p1 = pnand %p999_p12, %p993_p4 }
  0x5d   : > { %v401_v33 = vcombine.low %v1298_v25, %v1300_v29  ;;  %v479_v45 = vcombine.low %v1311_v38, %v1316_v41  ;;  %v577_v7 = vsel %vm384_vm1, %v575_v9, 0.0  ;;  %vm366_vm4 = vcmp.ne.s32.totalorder %v1336_v61, 4294967295 }
  0x5e   : > { %v1327_v57 = vmax.f32 %v542_v52, %v543_v54 }
  0x5f   : > { %v403_v37 = vsub.f32 %v1275_v3, %v401_v33  ;;  %v481_v48 = vsub.f32 %v1277_v4, %v479_v45  ;;  %v507_v33 = vsel %vm439_vm2, %v1277_v4, 0.0  ;;  %v450_v3 = vsel %vm384_vm1, %v442_v26, 0.0 }
  0x60   : > { %v547_v58 = vcombine.low %v1325_v56, %v1327_v57  ;;  %v444_v45 = vrot.slane %v443_v34, 4  ;;  %v451_v4 = vrot.slane %v450_v3, 4 }
  0x61   : > { %v404_v43 = vmul.f32 1.442695, %v403_v37  ;;  %v482_v51 = vmul.f32 1.442695, %v481_v48 }
  0x62   : > { %v549_v62 = vsub.f32 %v1296_v24, %v547_v58 }
  0x63   : > { %888 = vpow2.f32 %v404_v43  ;;  %v509_v43 = vsel %vm384_vm1, %v507_v33, 0.0 }
  0x64   : > { %890 = vpow2.f32 %v482_v51  ;;  %v550_v0 = vmul.f32 1.442695, %v549_v62  ;;  %v510_v50 = vrot.slane %v509_v43, 4  ;;  %v517_v62 = vrot.slane %v516_v49, 4 }
  0x66   : > { %892 = vpow2.f32 %v550_v0  ;;  %v576_v0 = vsel %vm440_vm3, %v1304_v31, 0.0  ;;  %v511_v24 = vadd.f32 %v510_v50, %v509_v43 }
  0x68   : > { %v512_v31 = vrot.slane %v511_v24, 2 }
  0x6a   : > { %v513_v33 = vadd.f32 %v512_v31, %v511_v24 }
  0x70   : > { %v889_v63 = vpop.eup %888 }
  0x71   : > { %v407_v2 = vcombine.high %v889_v63, %v889_v63  ;;  %v409_v6 = vsel %vm384_vm1, %v889_v63, 0.0  ;;  %v891_v14 = vpop.eup %890 }
  0x72   : > { %v410_v10 = vrot.slane %v409_v6, 4  ;;  %v485_v17 = vcombine.high %v891_v14, %v891_v14  ;;  %v487_v18 = vsel %vm384_vm1, %v891_v14, 0.0  ;;  %v452_v14 = vadd.f32 %v451_v4, %v450_v3 }
  0x73   : > { %v416_v11 = vsel %vm384_vm1, %v407_v2, 0.0  ;;  %v488_v19 = vrot.slane %v487_v18, 4  ;;  %v893_v46 = vpop.eup %892 }
  0x74   : > { %v411_v12 = vadd.f32 %v410_v10, %v409_v6  ;;  %v417_v13 = vrot.slane %v416_v11, 4  ;;  %v494_v23 = vsel %vm384_vm1, %v485_v17, 0.0  ;;  %v553_v51 = vcombine.high %v893_v46, %v893_v46 }
  0x75   : > { %v489_v27 = vadd.f32 %v488_v19, %v487_v18  ;;  %v495_v28 = vrot.slane %v494_v23, 4  ;;  %v555_v52 = vsel %vm384_vm1, %v893_v46, 0.0  ;;  %v578_v19 = vrot.slane %v577_v7, 4 }
  0x76   : > { %v412_v15 = vrot.slane %v411_v12, 2  ;;  %v418_v16 = vadd.f32 %v417_v13, %v416_v11  ;;  %v556_v58 = vrot.slane %v555_v52, 4  ;;  %v562_v63 = vsel %vm384_vm1, %v553_v51, 0.0 }
  0x77   : > { %v490_v35 = vrot.slane %v489_v27, 2  ;;  %v496_v36 = vadd.f32 %v495_v28, %v494_v23  ;;  %v563_v10 = vrot.slane %v562_v63, 4  ;;  %v445_v11 = vadd.f32 %v444_v45, %v443_v34 }
  0x78   : > { %v413_v20 = vadd.f32 %v412_v15, %v411_v12  ;;  %v419_v21 = vrot.slane %v418_v16, 2  ;;  %v557_v6 = vadd.f32 %v556_v58, %v555_v52  ;;  %v584_v15 = vsel %vm384_vm1, %v576_v0, 0.0 }
  0x79   : > { %v491_v40 = vadd.f32 %v490_v35, %v489_v27  ;;  %v497_v42 = vrot.slane %v496_v36, 2  ;;  %v564_v13 = vadd.f32 %v563_v10, %v562_v63  ;;  %v446_v8 = vrot.slane %v445_v11, 2 }
  0x7a   : > { %v414_v30 = vrot.slane %v413_v20, 1  ;;  %v420_v32 = vadd.f32 %v419_v21, %v418_v16  ;;  %v558_v12 = vrot.slane %v557_v6, 2  ;;  %v518_v16 = vadd.f32 %v517_v62, %v516_v49 }
  0x7b   : > { %v492_v47 = vrot.slane %v491_v40, 1  ;;  %v498_v48 = vadd.f32 %v497_v42, %v496_v36  ;;  %v565_v18 = vrot.slane %v564_v13, 2  ;;  %v585_v22 = vrot.slane %v584_v15, 4 }
  0x7c   : > { %v421_v37 = vrot.slane %v420_v32, 1  ;;  %v415_v5 = vadd.f32 %v414_v30, %v413_v20  ;;  %v559_v17 = vadd.f32 %v558_v12, %v557_v6  ;;  %v453_v23 = vrot.slane %v452_v14, 2 }
  0x7d   : > { %v493_v53 = vadd.f32 %v492_v47, %v491_v40  ;;  %v499_v54 = vrot.slane %v498_v48, 1  ;;  %v566_v21 = vadd.f32 %v565_v18, %v564_v13  ;;  %v519_v26 = vrot.slane %v518_v16, 2 }
  0x7e   : > { %v422_v44 = vadd.f32 %v421_v37, %v420_v32  ;;  %894 = vlog2.f32 %v415_v5  ;;  %v560_v20 = vrot.slane %v559_v17, 1  ;;  %v579_v30 = vadd.f32 %v578_v19, %v577_v7 }
  0x7f   : > { %v500_v2 = vadd.f32 %v499_v54, %v498_v48  ;;  %v567_v28 = vrot.slane %v566_v21, 1  ;;  %v447_v32 = vadd.f32 %v446_v8, %v445_v11  ;;  %v586_v35 = vadd.f32 %v585_v22, %v584_v15 }
  0x80   : > { %896 = vlog2.f32 %v422_v44  ;;  %v561_v27 = vadd.f32 %v560_v20, %v559_v17  ;;  %v454_v37 = vadd.f32 %v453_v23, %v452_v14  ;;  %v520_v39 = vadd.f32 %v519_v26, %v518_v16 }
  0x81   : > { %898 = vlog2.f32 %v493_v53  ;;  %v568_v34 = vadd.f32 %v567_v28, %v566_v21  ;;  %v580_v5 = vrot.slane %v579_v30, 2  ;;  %v448_v42 = vrot.slane %v447_v32, 1 }
  0x82   : > { %900 = vlog2.f32 %v500_v2  ;;  %v514_v45 = vrot.slane %v513_v33, 1  ;;  %v587_v46 = vrot.slane %v586_v35, 2  ;;  %v455_v47 = vrot.slane %v454_v37, 1 }
  0x83   : > { %902 = vlog2.f32 %v561_v27  ;;  %v521_v50 = vrot.slane %v520_v39, 1  ;;  %v581_v51 = vadd.f32 %v580_v5, %v579_v30  ;;  %v449_v52 = vadd.f32 %v448_v42, %v447_v32 }
  0x84   : > { %904 = vlog2.f32 %v568_v34  ;;  %v515_v54 = vadd.f32 %v514_v45, %v513_v33  ;;  %v588_v58 = vadd.f32 %v587_v46, %v586_v35  ;;  %v456_v62 = vadd.f32 %v455_v47, %v454_v37  ;;  %v595_v33 = vld [vmem:[%s1270_s14] sm:$0x3] }
  0x85   : > { %v522_v2 = vadd.f32 %v521_v50, %v520_v39  ;;  %v582_v6 = vrot.slane %v581_v51, 1  ;;  %v1080_v10 = vmov 0   ;;  %v1081_v17 = vmov 1966171168  }
  0x86   : > { %v367_v11 = vsel %vm366_vm4, 1, %v1080_v10  ;;  %v589_v12 = vrot.slane %v588_v58, 1 }
  0x87   : > { %v583_v15 = vadd.f32 %v582_v6, %v581_v51  ;;  %v371_v61 = vrot.slane %v367_v11, %v370_v59  ;;  %v375_v31 = vrot.slane %v367_v11, %v374_v60 }
  0x88   : > { %v590_v8 = vadd.f32 %v589_v12, %v588_v58 }
  0x89   : > { %vm376_vm5 = vcmp.ne.s32.totalorder %v371_v61, 0  ;;  %vm377_vm6 = vcmp.ne.s32.totalorder %v375_v31, 0 }
  0x8b   : > { %v895_v36 = vpop.eup %894 }
  0x8c   : > { %v424_v43 = vmul.f32 0.6931472, %v895_v36 }
  0x8d   : > { %v897_v3 = vpop.eup %896 }
  0x8e   : > { %v899_v40 = vpop.eup %898  ;;  %v426_v48 = vmul.f32 0.6931472, %v897_v3  ;;  %v427_v9 = vadd.f32 %v424_v43, %v1298_v25 }
  0x8f   : > { %v502_v44 = vmul.f32 0.6931472, %v899_v40  ;;  %v901_v4 = vpop.eup %900 }
  0x90   : > { %v504_v49 = vmul.f32 0.6931472, %v901_v4  ;;  %v428_v63 = vadd.f32 %v426_v48, %v1300_v29  ;;  %v457_v7 = vsub.f32 %v427_v9, %v449_v52  ;;  %v903_v13 = vpop.eup %902  ;;  %v602_v29 = vunpack.c.l.s4 %v1081_v17 }
  0x91   : > { %v505_v53 = vadd.f32 %v502_v44, %v1311_v38  ;;  %v570_v38 = vmul.f32 0.6931472, %v903_v13  ;;  %v905_v16 = vpop.eup %904 }
  0x92   : > { %v506_v0 = vadd.f32 %v504_v49, %v1316_v41  ;;  %v458_v25 = vsub.f32 %v428_v63, %v456_v62  ;;  %v572_v41 = vmul.f32 0.6931472, %v905_v16  ;;  %v603_v23 = vunpack.c.0.s8 %v602_v29 }
  0x93   : > { %v523_v24 = vsub.f32 %v505_v53, %v515_v54  ;;  %v573_v19 = vadd.f32 %v570_v38, %v1325_v56 }
  0x94   : > { %v524_v14 = vsub.f32 %v506_v0, %v522_v2  ;;  %v574_v21 = vadd.f32 %v572_v41, %v1327_v57  ;;  %v606_v28 = vsub.s32 %v603_v23, %v1323_v55 }
  0x95   : > { %v525_v18 = vadd.f32 %v523_v24, %v457_v7  ;;  %v591_v22 = vsub.f32 %v573_v19, %v583_v15 }
  0x96   : > { %v526_v20 = vadd.f32 %v524_v14, %v458_v25  ;;  %v592_v59 = vsub.f32 %v574_v21, %v590_v8 }
  0x97   : > { %v593_v26 = vadd.f32 %v591_v22, %v525_v18 }
  0x98   : > { %v594_v27 = vadd.f32 %v592_v59, %v526_v20 }
  0x99   : > { %v596_v56 = vsel %vm376_vm5, %v593_v26, 0.0 }
  0x9a   : > { %v597_v30 = vsel %vm377_vm6, %v594_v27, 0.0 }
  0x9b   : > { %v600_v60 = vcombine.low %v596_v56, %v597_v30 }
  0x9d   : > { %v607_v32 = vrot.slane %v600_v60, %v606_v28 }
  0x9f   : > { %v614_v57 = vrot.slane %v607_v32, %v606_v28 }
  0xa1   : > { %v616_v34 = vadd.f32 %v614_v57, %v595_v33 }
  0xa3   : > { %621 = vst.msk [vmem:[%s1270_s14] sm:$0x3] %vm1266_vm0, %v616_v34 }
  0xa4   : > { %1003 = shalt.err (!%p1000_p1)
}
  0xa5   : > { %s1004_s7 = scalar_lea.hbm %s635_s6, 32  ;;  %s1008_s9 = scalar_lea.hbm %s1438_s4, 64 }
  0xa6   : > { %p1005_p2 = scmp.ne.s32.totalorder %s635_s6, %s1004_s7  ;;  %p1009_p7 = scmp.lt.s32.totalorder %s635_s6, %s1438_s4 }
  0xa7   : > { %p1010_p8 = scmp.lt.s32.totalorder %s1008_s9, %s1004_s7 }
  0xa8   : > { %p1006_p5 = pnand %p1005_p2, %p1163_p9 }
  0xa9   : > { %p1011_p0 = por %p1010_p8, %p1009_p7 }
  0xaa   : > { %p1007_p6 = pneg %p1006_p5 }
  0xac   : > { %p1012_p3 = pnand %p1011_p0, %p1007_p6 }
  0xae   : > { %1015 = shalt.err (!%p1012_p3)
}
  0xaf   : > { %816 = dma.vmem_to_hbm [thread:$0]  (%p1163_p9), %s638_s29, 32, %s635_s6, %s623_s26  }
  0xb0 PF: > { %s649_s27 = sand.u32 1, %s1054_s15   ;;  %p1456_p4 = scmp.ge.s32.totalorder %s1074_s20, 2 }
  0xb1   : > { %s650_s11 = scalar_lea.sflag [#allocation4], %s649_s27 }
  0xb2   : > { %p829_p10 = pnand %p1456_p4, %p1170_p11 }
  0xb4   : > { %p830_p13 = pneg %p829_p10 }
  0xb6   : > { %1049 = dma.done.wait (%p830_p13), %s650_s11, 32  }
  0xb7   : > { %1051 = vsyncadd (%p830_p13), %s650_s11, 4294967264  ;;  %s23_s20 = sadd.s32 1, %s1074_s20   ;;  %s1457_s23 = sld [smem:[#allocation14_spill]] }
  0xb8   : > { %p20_p12 = scmp.ge.s32.totalorder %s23_s20, 4   ;;  %s1458_s18 = sld [smem:[#allocation12_spill]] }
  0xb9   : > { %s1459_s19 = sld [smem:[#allocation13_spill]]  ;;  %s1460_s15 = smov %s1058_s16 }
  0xba   : > { %s1461_s16 = smov %s1062_s17  ;;  %22 = sbr.rel (!%p20_p12) target bundleno = 10 (0xa), region = 112 }
  0xbd   : > { %s1462_s17 = smov %s1457_s23 }
  0xbf   :  { %655 = vsyncpa [#allocation3], 1 }
  0xc0   :  { %657 = vsyncpa [#allocation3 + $0x1], 1 }
  0xc1   :  { %658 = vsyncpa [#allocation6], 1 }
  0xc2   :  { %660 = vsyncpa [#allocation6 + $0x1], 1 }
  0xc3   :  { %661 = vsyncpa [#allocation4], 1 }
  0xc4   :  { %663 = vsyncpa [#allocation4 + $0x1], 1 }

</bundles_post_ra>
